<compile_context>
chip_gen: v6e
topology: v6e:2x2x1
jax: 0.10.0
libtpu: 0.0.40
codegen_flags: <defaults>
</compile_context>

<pallas_src>
import functools

import jax
import jax.numpy as jnp
from jax import lax
from jax.experimental import pallas as pl
from jax.experimental.pallas import tpu as pltpu


def _mha_map_kernel(q_ref, k_ref, qw_ref, qb_ref, kw_ref, kb_ref, out_ref,
                    *, num_heads, head_dim, norm_fact):
    # q_ref  : [1, tq, D]      k_ref  : [1, D, HW]
    # qw_ref : [hidden, D]     qb_ref : [hidden, 1]
    # kw_ref : [hidden, D]     kb_ref : [hidden, 1]
    # out_ref: [1, tq, N*HW]
    q = q_ref[0]                              # [tq, D]
    k = k_ref[0]                              # [D, HW]  (HW on lanes, no wrapper transpose)

    # Projections, transposed so the head axis lands on sublanes.
    #   qp_t[h, i] = sum_d qw[h, d] * q[i, d]      -> [hidden, tq]
    #   kp_t[h, s] = sum_d kw[h, d] * k[d, s]      -> [hidden, HW]
    qp_t = lax.dot_general(qw_ref[...], q, (((1,), (1,)), ((), ())),
                           preferred_element_type=jnp.float32) + qb_ref[...]
    qp_t = qp_t * norm_fact                   # single scale of the tiny [hidden, tq] tensor
    kp_t = jnp.dot(kw_ref[...], k, preferred_element_type=jnp.float32) + kb_ref[...]

    hw = kp_t.shape[-1]
    # Per-head logits written straight into the output slab (no concatenate copy).
    # Head slices are f32 sublane slices (head_dim % 8 == 0 -> aligned, essentially
    # free ref views); cast to bf16 only for the MXU contraction (f32 accumulate).
    for n in range(num_heads):
        lo = n * head_dim
        qn = qp_t[lo:lo + head_dim, :].astype(jnp.bfloat16)      # [hd, tq]
        kn = kp_t[lo:lo + head_dim, :].astype(jnp.bfloat16)      # [hd, HW]
        logits_n = lax.dot_general(qn, kn, (((0,), (0,)), ((), ())),
                                   preferred_element_type=jnp.float32)  # [tq, HW]
        out_ref[0, :, n * hw:(n + 1) * hw] = logits_n

    # TODO(synk): optional `mask` (masked_fill with -inf before softmax) not implemented;
    # the module is exercised with mask=None.
    # Joint softmax over (heads, spatial) == softmax(weights.flatten(2), -1).
    logits = out_ref[0]                                          # [tq, N*HW]
    m = jnp.max(logits, axis=-1, keepdims=True)
    e = jnp.exp(logits - m)
    s = jnp.sum(e, axis=-1, keepdims=True)
    out_ref[0] = e * pl.reciprocal(s, approx=True)               # EUP recip + VPU mul (no divide)
    # dropout(p=0.0) is the identity in this forward pass.


def mh_attention_map(q, k, q_weight, q_bias, k_weight, k_bias, num_heads, *, tq=None):
    """q: [B, Q, D], k: [B, D, H, W]; weights: [hidden, D]; biases: [hidden]."""
    B, Q, D = q.shape
    _, C, H, W = k.shape
    assert C == D
    hidden = q_weight.shape[0]
    head_dim = hidden // num_heads
    assert head_dim * num_heads == hidden and head_dim % 8 == 0
    norm_fact = float(hidden / num_heads) ** (-0.5)
    HW = H * W

    # Q tiling: pad Q to a sublane-aligned tile so vregs stay full.  `tq` is the
    # VMEM / megacore knob: default is the whole (padded) Q in one block; shrink it
    # on v5e / v7x (smaller scoped VMEM) or to feed both v7x TensorCores when B is
    # small.  Note: with several q-blocks the small k projection is recomputed per
    # block, which keeps both grid axes safely "parallel".
    if tq is None:
        tq = ((Q + 7) // 8) * 8
    assert tq % 8 == 0
    Q_pad = ((Q + tq - 1) // tq) * tq
    if Q_pad != Q:
        q = jnp.pad(q, ((0, 0), (0, Q_pad - Q), (0, 0)))
    nq = Q_pad // tq

    # No wrapper-side transpose of k (that was a full extra HBM pass): keep [B, D, HW]
    # so HW is the lane dimension inside the kernel.
    k_flat = k.reshape(B, D, HW)
    qb2 = q_bias.reshape(hidden, 1)
    kb2 = k_bias.reshape(hidden, 1)

    kernel = functools.partial(_mha_map_kernel, num_heads=num_heads,
                               head_dim=head_dim, norm_fact=norm_fact)

    out_flat = pl.pallas_call(
        kernel,
        out_shape=jax.ShapeDtypeStruct((B, Q_pad, num_heads * HW), jnp.float32),
        grid=(B, nq),
        in_specs=[
            pl.BlockSpec((1, tq, D), lambda b, qi: (b, qi, 0)),
            pl.BlockSpec((1, D, HW), lambda b, qi: (b, 0, 0)),   # same block across qi: re-DMA elided
            pl.BlockSpec((hidden, D), lambda b, qi: (0, 0)),
            pl.BlockSpec((hidden, 1), lambda b, qi: (0, 0)),
            pl.BlockSpec((hidden, D), lambda b, qi: (0, 0)),
            pl.BlockSpec((hidden, 1), lambda b, qi: (0, 0)),
        ],
        out_specs=pl.BlockSpec((1, tq, num_heads * HW), lambda b, qi: (b, qi, 0)),
        compiler_params=pltpu.CompilerParams(
            dimension_semantics=("parallel", "parallel")),
    )(q, k_flat, q_weight, qb2, k_weight, kb2)

    out = out_flat[:, :Q, :]
    return out.reshape(B, Q, num_heads, H, W)


def _reference(q, k, q_weight, q_bias, k_weight, k_bias, num_heads):
    """Pure-JAX f32 reference mirroring the PyTorch forward."""
    B, Q, D = q.shape
    hidden = q_weight.shape[0]
    hd = hidden // num_heads
    norm = float(hidden / num_heads) ** (-0.5)
    H, W = k.shape[2], k.shape[3]
    qp = q @ q_weight.T + q_bias                                        # [B,Q,hidden]
    kp = jnp.einsum('bchw,oc->bohw', k, k_weight) + k_bias[None, :, None, None]
    qh = qp.reshape(B, Q, num_heads, hd)
    kh = kp.reshape(B, num_heads, hd, H, W)
    w = jnp.einsum('bqnc,bnchw->bqnhw', qh * norm, kh)
    wf = w.reshape(B, Q, -1)
    wf = jax.nn.softmax(wf, axis=-1)
    return wf.reshape(B, Q, num_heads, H, W)


def _xavier_uniform(key, shape):
    fan_out, fan_in = shape
    limit = (6.0 / (fan_in + fan_out)) ** 0.5
    return jax.random.uniform(key, shape, jnp.float32, -limit, limit)


if __name__ == "__main__":
    # Small shapes consistent with the module's forward.
    B, Q, D = 2, 16, 32           # batch, num object queries, query_dim
    hidden, num_heads = 32, 4     # hidden_dim, num_heads  (head_dim = 8)
    H = W = 16

    key = jax.random.PRNGKey(0)
    kq, kk, kwq, kwk = jax.random.split(key, 4)

    q = jax.random.normal(kq, (B, Q, D), jnp.float32)
    k = jax.random.normal(kk, (B, D, H, W), jnp.float32)        # NCHW feature map

    # Deterministic parameter init (xavier_uniform weights, zero biases, per __init__).
    q_weight = _xavier_uniform(kwq, (hidden, D))
    k_weight = _xavier_uniform(kwk, (hidden, D))
    q_bias = jnp.zeros((hidden,), jnp.float32)
    k_bias = jnp.zeros((hidden,), jnp.float32)

    # tq=8 exercises the Q-tiled grid: grid = (B, Q//tq) = (2, 2), both axes parallel.
    out = mh_attention_map(q, k, q_weight, q_bias, k_weight, k_bias, num_heads, tq=8)
    out = jax.block_until_ready(out)

    ref = _reference(q, k, q_weight, q_bias, k_weight, k_bias, num_heads)
    assert out.shape == (B, Q, num_heads, H, W)
    # bf16 MXU inputs for QK^T + approx reciprocal -> compare with relaxed tolerance.
    assert jnp.allclose(out, ref, atol=1e-3, rtol=1e-2), "mismatch vs reference"

    print("KERNEL_OK")
</pallas_src>

<mosaic_0001>
module attributes {stable_mosaic.version = 11 : i64} {
  func.func @_mha_map_kernel(%arg0: i32, %arg1: i32, %arg2: memref<1x8x32xf32, #tpu.memory_space<vmem>>, %arg3: memref<1x32x256xf32, #tpu.memory_space<vmem>>, %arg4: memref<32x32xf32, #tpu.memory_space<vmem>>, %arg5: memref<32x1xf32, #tpu.memory_space<vmem>>, %arg6: memref<32x32xf32, #tpu.memory_space<vmem>>, %arg7: memref<32x1xf32, #tpu.memory_space<vmem>>, %arg8: memref<1x8x1024xf32, #tpu.memory_space<vmem>>) attributes {dimension_semantics = [#tpu.dimension_semantics<parallel>, #tpu.dimension_semantics<parallel>], iteration_bounds = array<i64: 2, 2>, scalar_prefetch = 0 : i64, scratch_operands = 0 : i64, tpu.core_type = #tpu.core_type<tc>, window_params = [{transform_indices = @transform_0, window_bounds = array<i64: 1, 8, 32>}, {transform_indices = @transform_1, window_bounds = array<i64: 1, 32, 256>}, {pipeline_mode = #tpu.pipeline_mode<synchronous>, transform_indices = @transform_2, window_bounds = array<i64: 32, 32>}, {pipeline_mode = #tpu.pipeline_mode<synchronous>, transform_indices = @transform_3, window_bounds = array<i64: 32, 1>}, {pipeline_mode = #tpu.pipeline_mode<synchronous>, transform_indices = @transform_4, window_bounds = array<i64: 32, 32>}, {pipeline_mode = #tpu.pipeline_mode<synchronous>, transform_indices = @transform_5, window_bounds = array<i64: 32, 1>}, {transform_indices = @transform_6, window_bounds = array<i64: 1, 8, 1024>}]} {
    %c0 = arith.constant 0 : index
    %c0_0 = arith.constant 0 : index
    %c0_1 = arith.constant 0 : index
    %0 = vector.load %arg2[%c0, %c0_0, %c0_1] : memref<1x8x32xf32, #tpu.memory_space<vmem>>, vector<1x8x32xf32>
    %1 = vector.shape_cast %0 : vector<1x8x32xf32> to vector<8x32xf32>
    %c0_2 = arith.constant 0 : index
    %c0_3 = arith.constant 0 : index
    %c0_4 = arith.constant 0 : index
    %2 = vector.load %arg3[%c0_2, %c0_3, %c0_4] : memref<1x32x256xf32, #tpu.memory_space<vmem>>, vector<1x32x256xf32>
    %3 = vector.shape_cast %2 : vector<1x32x256xf32> to vector<32x256xf32>
    %c0_5 = arith.constant 0 : index
    %c0_6 = arith.constant 0 : index
    %4 = vector.load %arg4[%c0_5, %c0_6] : memref<32x32xf32, #tpu.memory_space<vmem>>, vector<32x32xf32>
    %cst = arith.constant dense<0.000000e+00> : vector<32x8xf32>
    %5 = tpu.matmul %4, %1, %cst {dimension_numbers = #tpu.dot_dimension_numbers<[1], [1], [0], [0], [0, 0, 1, 0], [], []>} : vector<32x32xf32>, vector<8x32xf32>, vector<32x8xf32> -> vector<32x8xf32>
    %c0_7 = arith.constant 0 : index
    %c0_8 = arith.constant 0 : index
    %6 = vector.load %arg5[%c0_7, %c0_8] : memref<32x1xf32, #tpu.memory_space<vmem>>, vector<32x1xf32>
    %7 = vector.broadcast %6 : vector<32x1xf32> to vector<32x8xf32>
    %8 = arith.addf %5, %7 : vector<32x8xf32>
    %cst_9 = arith.constant 0.353553385 : f32
    %9 = vector.broadcast %cst_9 : f32 to vector<32x8xf32>
    %10 = arith.mulf %8, %9 : vector<32x8xf32>
    %c0_10 = arith.constant 0 : index
    %c0_11 = arith.constant 0 : index
    %11 = vector.load %arg6[%c0_10, %c0_11] : memref<32x32xf32, #tpu.memory_space<vmem>>, vector<32x32xf32>
    %cst_12 = arith.constant dense<0.000000e+00> : vector<32x256xf32>
    %12 = tpu.matmul %11, %3, %cst_12 {dimension_numbers = #tpu.dot_dimension_numbers<[1], [0], [0], [1], [0, 0, 1, 1], [], []>} : vector<32x32xf32>, vector<32x256xf32>, vector<32x256xf32> -> vector<32x256xf32>
    %c0_13 = arith.constant 0 : index
    %c0_14 = arith.constant 0 : index
    %13 = vector.load %arg7[%c0_13, %c0_14] : memref<32x1xf32, #tpu.memory_space<vmem>>, vector<32x1xf32>
    %14 = vector.broadcast %13 : vector<32x1xf32> to vector<32x256xf32>
    %15 = arith.addf %12, %14 : vector<32x256xf32>
    %16 = vector.extract_strided_slice %10 {offsets = [0, 0], sizes = [8, 8], strides = [1, 1]} : vector<32x8xf32> to vector<8x8xf32>
    %17 = arith.truncf %16 : vector<8x8xf32> to vector<8x8xbf16>
    %18 = vector.extract_strided_slice %15 {offsets = [0, 0], sizes = [8, 256], strides = [1, 1]} : vector<32x256xf32> to vector<8x256xf32>
    %19 = arith.truncf %18 : vector<8x256xf32> to vector<8x256xbf16>
    %cst_15 = arith.constant dense<0.000000e+00> : vector<8x256xf32>
    %20 = tpu.matmul %17, %19, %cst_15 {dimension_numbers = #tpu.dot_dimension_numbers<[0], [0], [1], [1], [0, 1, 1, 1], [], []>} : vector<8x8xbf16>, vector<8x256xbf16>, vector<8x256xf32> -> vector<8x256xf32>
    %c0_16 = arith.constant 0 : index
    %c0_17 = arith.constant 0 : index
    %c0_18 = arith.constant 0 : index
    %21 = vector.load %arg8[%c0_16, %c0_17, %c0_18] : memref<1x8x1024xf32, #tpu.memory_space<vmem>>, vector<1x8x256xf32>
    %22 = vector.shape_cast %21 : vector<1x8x256xf32> to vector<8x256xf32>
    %23 = vector.shape_cast %20 : vector<8x256xf32> to vector<1x8x256xf32>
    tpu.vector_store %arg8[%c0_16, %c0_17, %c0_18], %23 {strides = array<i32>} : memref<1x8x1024xf32, #tpu.memory_space<vmem>>, vector<1x8x256xf32>,
    %24 = vector.extract_strided_slice %10 {offsets = [8, 0], sizes = [8, 8], strides = [1, 1]} : vector<32x8xf32> to vector<8x8xf32>
    %25 = arith.truncf %24 : vector<8x8xf32> to vector<8x8xbf16>
    %26 = vector.extract_strided_slice %15 {offsets = [8, 0], sizes = [8, 256], strides = [1, 1]} : vector<32x256xf32> to vector<8x256xf32>
    %27 = arith.truncf %26 : vector<8x256xf32> to vector<8x256xbf16>
    %cst_19 = arith.constant dense<0.000000e+00> : vector<8x256xf32>
    %28 = tpu.matmul %25, %27, %cst_19 {dimension_numbers = #tpu.dot_dimension_numbers<[0], [0], [1], [1], [0, 1, 1, 1], [], []>} : vector<8x8xbf16>, vector<8x256xbf16>, vector<8x256xf32> -> vector<8x256xf32>
    %c0_20 = arith.constant 0 : index
    %c0_21 = arith.constant 0 : index
    %c256 = arith.constant 256 : index
    %29 = vector.load %arg8[%c0_20, %c0_21, %c256] : memref<1x8x1024xf32, #tpu.memory_space<vmem>>, vector<1x8x256xf32>
    %30 = vector.shape_cast %29 : vector<1x8x256xf32> to vector<8x256xf32>
    %31 = vector.shape_cast %28 : vector<8x256xf32> to vector<1x8x256xf32>
    tpu.vector_store %arg8[%c0_20, %c0_21, %c256], %31 {strides = array<i32>} : memref<1x8x1024xf32, #tpu.memory_space<vmem>>, vector<1x8x256xf32>,
    %32 = vector.extract_strided_slice %10 {offsets = [16, 0], sizes = [8, 8], strides = [1, 1]} : vector<32x8xf32> to vector<8x8xf32>
    %33 = arith.truncf %32 : vector<8x8xf32> to vector<8x8xbf16>
    %34 = vector.extract_strided_slice %15 {offsets = [16, 0], sizes = [8, 256], strides = [1, 1]} : vector<32x256xf32> to vector<8x256xf32>
    %35 = arith.truncf %34 : vector<8x256xf32> to vector<8x256xbf16>
    %cst_22 = arith.constant dense<0.000000e+00> : vector<8x256xf32>
    %36 = tpu.matmul %33, %35, %cst_22 {dimension_numbers = #tpu.dot_dimension_numbers<[0], [0], [1], [1], [0, 1, 1, 1], [], []>} : vector<8x8xbf16>, vector<8x256xbf16>, vector<8x256xf32> -> vector<8x256xf32>
    %c0_23 = arith.constant 0 : index
    %c0_24 = arith.constant 0 : index
    %c512 = arith.constant 512 : index
    %37 = vector.load %arg8[%c0_23, %c0_24, %c512] : memref<1x8x1024xf32, #tpu.memory_space<vmem>>, vector<1x8x256xf32>
    %38 = vector.shape_cast %37 : vector<1x8x256xf32> to vector<8x256xf32>
    %39 = vector.shape_cast %36 : vector<8x256xf32> to vector<1x8x256xf32>
    tpu.vector_store %arg8[%c0_23, %c0_24, %c512], %39 {strides = array<i32>} : memref<1x8x1024xf32, #tpu.memory_space<vmem>>, vector<1x8x256xf32>,
    %40 = vector.extract_strided_slice %10 {offsets = [24, 0], sizes = [8, 8], strides = [1, 1]} : vector<32x8xf32> to vector<8x8xf32>
    %41 = arith.truncf %40 : vector<8x8xf32> to vector<8x8xbf16>
    %42 = vector.extract_strided_slice %15 {offsets = [24, 0], sizes = [8, 256], strides = [1, 1]} : vector<32x256xf32> to vector<8x256xf32>
    %43 = arith.truncf %42 : vector<8x256xf32> to vector<8x256xbf16>
    %cst_25 = arith.constant dense<0.000000e+00> : vector<8x256xf32>
    %44 = tpu.matmul %41, %43, %cst_25 {dimension_numbers = #tpu.dot_dimension_numbers<[0], [0], [1], [1], [0, 1, 1, 1], [], []>} : vector<8x8xbf16>, vector<8x256xbf16>, vector<8x256xf32> -> vector<8x256xf32>
    %c0_26 = arith.constant 0 : index
    %c0_27 = arith.constant 0 : index
    %c768 = arith.constant 768 : index
    %45 = vector.load %arg8[%c0_26, %c0_27, %c768] : memref<1x8x1024xf32, #tpu.memory_space<vmem>>, vector<1x8x256xf32>
    %46 = vector.shape_cast %45 : vector<1x8x256xf32> to vector<8x256xf32>
    %47 = vector.shape_cast %44 : vector<8x256xf32> to vector<1x8x256xf32>
    tpu.vector_store %arg8[%c0_26, %c0_27, %c768], %47 {strides = array<i32>} : memref<1x8x1024xf32, #tpu.memory_space<vmem>>, vector<1x8x256xf32>,
    %c0_28 = arith.constant 0 : index
    %c0_29 = arith.constant 0 : index
    %c0_30 = arith.constant 0 : index
    %48 = vector.load %arg8[%c0_28, %c0_29, %c0_30] : memref<1x8x1024xf32, #tpu.memory_space<vmem>>, vector<1x8x1024xf32>
    %49 = vector.shape_cast %48 : vector<1x8x1024xf32> to vector<8x1024xf32>
    %cst_31 = arith.constant dense<0xFF800000> : vector<8xf32>
    %50 = vector.multi_reduction <maximumf>, %49, %cst_31 [1] : vector<8x1024xf32> to vector<8xf32>
    %51 = vector.shape_cast %50 : vector<8xf32> to vector<8x1xf32>
    %52 = vector.broadcast %51 : vector<8x1xf32> to vector<8x1024xf32>
    %53 = arith.subf %49, %52 : vector<8x1024xf32>
    %54 = math.exp %53 : vector<8x1024xf32>
    %cst_32 = arith.constant dense<0.000000e+00> : vector<8xf32>
    %55 = vector.multi_reduction <add>, %54, %cst_32 [1] : vector<8x1024xf32> to vector<8xf32>
    %56 = vector.shape_cast %55 : vector<8xf32> to vector<8x1xf32>
    %57 = tpu.reciprocal %56 {approx = true} : vector<8x1xf32> -> vector<8x1xf32>
    %58 = vector.broadcast %57 : vector<8x1xf32> to vector<8x1024xf32>
    %59 = arith.mulf %54, %58 : vector<8x1024xf32>
    %c0_33 = arith.constant 0 : index
    %c0_34 = arith.constant 0 : index
    %c0_35 = arith.constant 0 : index
    %60 = vector.load %arg8[%c0_33, %c0_34, %c0_35] : memref<1x8x1024xf32, #tpu.memory_space<vmem>>, vector<1x8x1024xf32>
    %61 = vector.shape_cast %60 : vector<1x8x1024xf32> to vector<8x1024xf32>
    %62 = vector.shape_cast %59 : vector<8x1024xf32> to vector<1x8x1024xf32>
    tpu.vector_store %arg8[%c0_33, %c0_34, %c0_35], %62 {strides = array<i32>} : memref<1x8x1024xf32, #tpu.memory_space<vmem>>, vector<1x8x1024xf32>,
    return
  }
  func.func @transform_0(%arg0: i32, %arg1: i32) -> (i32, i32, i32) {
    %c0_i32 = arith.constant 0 : i32
    %c0_i32_0 = arith.constant 0 : i32
    return %arg0, %arg1, %c0_i32 : i32, i32, i32
  }
  func.func @transform_1(%arg0: i32, %arg1: i32) -> (i32, i32, i32) {
    %c0_i32 = arith.constant 0 : i32
    %c0_i32_0 = arith.constant 0 : i32
    %c0_i32_1 = arith.constant 0 : i32
    return %arg0, %c0_i32, %c0_i32_0 : i32, i32, i32
  }
  func.func @transform_2(%arg0: i32, %arg1: i32) -> (i32, i32) {
    %c0_i32 = arith.constant 0 : i32
    %c0_i32_0 = arith.constant 0 : i32
    %c0_i32_1 = arith.constant 0 : i32
    return %c0_i32, %c0_i32_0 : i32, i32
  }
  func.func @transform_3(%arg0: i32, %arg1: i32) -> (i32, i32) {
    %c0_i32 = arith.constant 0 : i32
    %c0_i32_0 = arith.constant 0 : i32
    %c0_i32_1 = arith.constant 0 : i32
    return %c0_i32, %c0_i32_0 : i32, i32
  }
  func.func @transform_4(%arg0: i32, %arg1: i32) -> (i32, i32) {
    %c0_i32 = arith.constant 0 : i32
    %c0_i32_0 = arith.constant 0 : i32
    %c0_i32_1 = arith.constant 0 : i32
    return %c0_i32, %c0_i32_0 : i32, i32
  }
  func.func @transform_5(%arg0: i32, %arg1: i32) -> (i32, i32) {
    %c0_i32 = arith.constant 0 : i32
    %c0_i32_0 = arith.constant 0 : i32
    %c0_i32_1 = arith.constant 0 : i32
    return %c0_i32, %c0_i32_0 : i32, i32
  }
  func.func @transform_6(%arg0: i32, %arg1: i32) -> (i32, i32, i32) {
    %c0_i32 = arith.constant 0 : i32
    %c0_i32_0 = arith.constant 0 : i32
    return %arg0, %arg1, %c0_i32 : i32, i32, i32
  }
}

</mosaic_0001>

<bundles_post_ra>
// kernel: tpu_custom_call.1
= control target key start
LH: loop header
LB: loop body
LE: loop exit
PB: predicated region body
PF: predicated region fallthrough
CT: control target
= control target key end

     0   :  { %s1794_s0 = inlined_call_operand.vmem [shape: f32[2,16,32], index: 0, kind: input, shape index: {}]   ;;  %s1795_s1 = inlined_call_operand.hbm [shape: f32[2,32,256], index: 1, kind: input, shape index: {}]   ;;  %s1796_s2 = inlined_call_operand.vmem [shape: f32[32,32], index: 2, kind: input, shape index: {}]   ;;  %s1797_s3 = inlined_call_operand.vmem [shape: f32[32,1], index: 3, kind: input, shape index: {}]   ;;  %s1798_s4 = inlined_call_operand.hbm [shape: f32[32,32], index: 4, kind: input, shape index: {}]   ;;  %s1799_s5 = inlined_call_operand.vmem [shape: f32[32,1], index: 5, kind: input, shape index: {}]   ;;  %s1800_s6 = inlined_call_operand.hbm [shape: f32[2,16,1024], index: 6, kind: output, shape index: {}]  }
   0x1   :  { %1812 = sst [smem:[#allocation18_spill]] %s1798_s4 }
   0x2   :  { %1813 = sst [smem:[#allocation19_spill]] %s1799_s5 }
   0x3   :  { %1814 = sst [smem:[#allocation20_spill]] %s1800_s6 }
   0x4   :  { %11 = vsyncpa [#allocation3], 0 }
   0x5   :  { %13 = vsyncpa [#allocation3 + $0x1], 0 }
   0x6   :  { %14 = vsyncpa [#allocation6], 0 }
   0x7   :  { %15 = vsyncpa [#allocation4], 0 }
   0x8   :  { %17 = vsyncpa [#allocation4 + $0x1], 0  ;;  %s1498_s21 = smov 0   ;;  %s1500_s22 = smov 0  }
   0x9   :  { %s1502_s23 = smov 0   ;;  %s1504_s24 = smov 0  }
   0xa   :  { %s1506_s25 = smov 0   ;;  %s1508_s26 = smov 0  }
   0xb   :  { %s1510_s27 = smov 0   ;;  %s1512_s28 = smov 0  }
   0xc   :  { %s1514_s29 = smov 0   ;;  %s1516_s30 = smov 0  }
   0xd   :  { %s1518_s7 = smov 0  }
   0xe LB: > { %1815 = sst [smem:[#allocation11_spill]] %s1412_s21  ;;  %s1084_s8 = sadd.s32 4294967295, %s1452_s7   ;;  %s1452_s7 = sphi %s1518_s7, %s23_s7   ;;  %s1448_s30 = sphi %s1516_s30, %s1850_s30   ;;  %s1444_s29 = sphi %s1514_s29, %s1849_s29   ;;  %s1440_s28 = sphi %s1512_s28, %s1848_s28   ;;  %s1436_s27 = sphi %s1510_s27, %s1840_s27   ;;  %s1432_s26 = sphi %s1508_s26, %s1847_s26   ;;  %s1428_s25 = sphi %s1506_s25, %s1846_s25   ;;  %s1424_s24 = sphi %s1504_s24, %s1845_s24   ;;  %s1420_s23 = sphi %s1502_s23, %s1844_s23   ;;  %s1416_s22 = sphi %s1500_s22, %s1843_s22   ;;  %s1412_s21 = sphi %s1498_s21, %s1839_s21  }
   0xf   : > { %1816 = sst [smem:[#allocation12_spill]] %s1416_s22  ;;  %s1085_s9 = sadd.s32 4294967294, %s1452_s7  }
  0x10   : > { %1817 = sst [smem:[#allocation13_spill]] %s1444_s29  ;;  %p83_p0 = scmp.ne.s32.totalorder %s1428_s25, %s1424_s24 }
  0x11   : > { %p1554_p1 = scmp.eq.s32.totalorder %s1084_s8, 0  ;;  %p192_p2 = scmp.ne.s32.totalorder %s1420_s23, %s1416_s22 }
  0x12   : > { %p193_p4 = scmp.eq.s32.totalorder %s1084_s8, 3  ;;  %p198_p5 = scmp.ne.s32.totalorder %s1416_s22, %s1412_s21 }
  0x13   : > { %p1563_p3 = por %p1554_p1, %p83_p0  ;;  %p199_p6 = scmp.eq.s32.totalorder %s1085_s9, 3 }
  0x14   : > { %p1569_p7 = por %p193_p4, %p192_p2  ;;  %p1086_p8 = scmp.ge.s32.totalorder %s1452_s7, 1 }
  0x15   : > { %p1574_p9 = por %p199_p6, %p198_p5  ;;  %p206_p10 = scmp.lt.s32.totalorder %s1452_s7, 5 }
  0x16   : > { %s1820_s13 = scalar_select %p1569_p7, 1, 0 }
  0x17   : > { %s1822_s14 = scalar_select %p1574_p9, 1, 0 }
  0x18   : > { %1821 = sst [smem:[#allocation14_spill]] %s1820_s13  ;;  %p1579_p11 = pnand %p1086_p8, %p206_p10 }
  0x19   : > { %1823 = sst [smem:[#allocation15_spill]] %s1822_s14  ;;  %s1454_s16 = smov [#allocation5]  }
  0x1a   : > { %s224_s17 = sshll.u32 %s1454_s16, 4  ;;  %p1143_p12 = pneg %p1579_p11  ;;  %s225_s17 = int_to_ptr.vmem [resolvable:$true] %s224_s17 }
  0x1b   : > { %s1285_s18 = scalar_lea.vmem %s225_s17, 512  ;;  %p1293_p6 = scmp.lt.s32.totalorder %s225_s17, %s225_s17 }
  0x1c   : > { %p1144_p13 = pnand %p1143_p12, %p1554_p1  ;;  %p1286_p2 = scmp.ne.s32.totalorder %s225_s17, %s1285_s18 }
  0x1d   : > { %p1294_p9 = scmp.lt.s32.totalorder %s1285_s18, %s1285_s18 }
  0x1e   : > { %p1276_p0 = pneg %p1144_p13 }
  0x1f   : > { %p1295_p7 = por %p1294_p9, %p1293_p6 }
  0x20   : > { %p1288_p4 = pnand %p1286_p2, %p1276_p0 }
  0x22   : > { %p1289_p5 = pneg %p1288_p4 }
  0x24   : > { %p1296_p8 = pnand %p1295_p7, %p1289_p5 }
  0x26   : > { %1299 = shalt.err (!%p1296_p8)
}
  0x27   : > { %s1455_s19 = smov 128   ;;  %s1456_s20 = smov 8  }
  0x28   : > { %s1825_s4 = sld [smem:[#allocation18_spill]]  ;;  %s32_s9 = sadd.s32 1, %s1444_s29 }
  0x29   : > { %p33_p7 = scmp.ge.s32.totalorder %s32_s9, 2  ;;  %s35_s16 = sadd.s32 1, %s1448_s30 }
  0x2a   : > { %s70_s18 = sadd.s32 1, %s1432_s26  ;;  %p77_p9 = scmp.ne.s32.totalorder %s1432_s26, %s1428_s25 }
  0x2b   : > { %s1852_s9 = smov (%p33_p7, %s32_s9), 0  ;;  %s1854_s16 = smov (!%p33_p7, %s35_s16), %s1448_s30 }
  0x2c   : > { %1826 = sst [smem:[#allocation16_spill]] %s1852_s9  ;;  %p78_p10 = scmp.eq.s32.totalorder %s1452_s7, 0 }
  0x2d   : > { %s178_s11 = ssub.s32 %s1444_s29, %s1852_s9  ;;  %p37_p12 = scmp.ge.s32.totalorder %s1854_s16, 2 }
  0x2e   : > { %1146 = dma.hbm_to_vmem [thread:$0]  (!%p1144_p13), %s1825_s4, 512, %s225_s17, [#allocation6], %s1455_s19, %s1455_s19, %s1456_s20  }
  0x2f   : > { %p1156_p0 = scmp.lt.s32.totalorder %s1452_s7, 4  ;;  %p1602_p13 = por %p78_p10, %p77_p9 }
  0x30   : > { %s252_s19 = sand.u32 1, %s1432_s26   ;;  %s1856_s16 = smov (%p37_p12, %s1854_s16), 0 }
  0x31   : > { %1828 = sst [smem:[#allocation17_spill]] %s1856_s16  ;;  %s1089_s20 = sshll.u32 %s252_s19, 6 }
  0x32   : > { %s67_s24 = ssub.s32 %s1448_s30, %s1856_s16  ;;  %s1121_s4 = sshll.u32 %s1448_s30, 10 }
  0x33   : > { %p68_p2 = scmp.eq.s32.totalorder %s67_s24, 0  ;;  %s179_s8 = sor.u32 %s178_s11, %s67_s24 }
  0x34   : > { %p180_p4 = scmp.eq.s32.totalorder %s179_s8, 0  ;;  %s1829_s9 = sadd.s32 1, %s1420_s23 }
  0x35   : > { %s1613_s14 = scalar_select %p68_p2, %s1432_s26, %s70_s18  }
  0x36   : > { %s1618_s29 = scalar_select %p180_p4, %s1420_s23, %s1829_s9  }
  0x37   : > { %s262_s13 = scalar_lea.hbm %s1795_s1, %s1121_s4  ;;  %s256_s22 = scalar_lea.vmem [#allocation2], %s1089_s20 }
  0x38   : > { %s263_s5 = sshll.u32 %s256_s22, 4  ;;  %p1627_p5 = pnand %p1156_p0, %p1602_p13  ;;  %s264_s5 = int_to_ptr.vmem [resolvable:$true] %s263_s5 }
  0x39   : > { %s253_s11 = scalar_lea.sflag [#allocation3], %s252_s19  ;;  %s1313_s18 = scalar_lea.vmem %s264_s5, 1024 }
  0x3a   : > { %p1302_p6 = pneg %p1627_p5  ;;  %p1314_p8 = scmp.ne.s32.totalorder %s264_s5, %s1313_s18 }
  0x3b   : > { %s1457_s9 = smov [#allocation2]  }
  0x3c   : > { %p1316_p7 = pnand %p1314_p8, %p1302_p6  ;;  %s1318_s6 = sshll.u32 %s1457_s9, 4  ;;  %s1319_s6 = int_to_ptr.vmem [resolvable:$false] %s1318_s6 }
  0x3d   : > { %s1320_s4 = scalar_lea.vmem %s1319_s6, 2048  ;;  %p1321_p10 = scmp.lt.s32.totalorder %s264_s5, %s1319_s6 }
  0x3e   : > { %p1317_p9 = pneg %p1316_p7  ;;  %p1322_p12 = scmp.lt.s32.totalorder %s1320_s4, %s1313_s18 }
  0x40   : > { %p1323_p2 = por %p1322_p12, %p1321_p10 }
  0x42   : > { %p1324_p4 = pnand %p1323_p2, %p1317_p9 }
  0x44   : > { %1327 = shalt.err (!%p1324_p4)
}
  0x45   : > { %s1458_s21 = smov 256   ;;  %s1459_s22 = smov 16  }
  0x46   : > { %1150 = dma.hbm_to_vmem [thread:$0]  (!%p1627_p5), %s262_s13, 1024, %s264_s5, %s253_s11, %s1458_s21, %s1458_s21, %s1459_s22  }
  0x47   : > { %275 = sbr.rel (%p1579_p11) target bundleno = 950 (0x3b6), region = 44  ;;  %s277_s17 = sand.u32 (!%p1579_p11), 1, %s1428_s25  }
  0x48   : > { %s1093_s19 = sshll.u32 (!%p1579_p11), %s277_s17, 6  ;;  %s278_s20 = scalar_lea.sflag (!%p1579_p11), [#allocation3], %s277_s17 }
  0x49   : > { %s1638_s24 = scalar_lea.vmem (!%p1579_p11), [#allocation2], %s1093_s19 }
  0x4c   : > { %1399 = dma.done.wait (%p1563_p3), %s278_s20, 1024  }
  0x4d   : > { %1401 = vsyncadd (%p1563_p3), %s278_s20, 4294966272 }
  0x4e   : > { %1403 = dma.done.wait (%p1554_p1), [#allocation6], 512  }
  0x4f   : > { %1405 = vsyncadd (%p1554_p1), [#allocation6], 4294966784  ;;  %p322_p11 = scmp.lt.s32.totalorder %s1440_s28, 1  ;;  %p324_p0 = scmp.lt.s32.totalorder %s1436_s27, 1  ;;  %v1460_v0 = vmov 0.0   ;;  %v1461_v1 = vmov 0  }
  0x50   : > { %577 = vmatprep.mubr.f32.mxu1 %v1460_v0  ;;  %1254 = vset.pattern.permute.xlu0 %v1461_v1  ;;  %vm368_vm0 = vcmask 261120   ;;  %v339_v2 = vld [vmem:[%s1638_s24 + $0x38] sm:$0xff]  ;;  %v338_v3 = vld [vmem:[%s1638_s24 + $0x30] sm:$0xff]  ;;  %v337_v4 = vld [vmem:[%s1638_s24 + $0x28] sm:$0xff]  ;;  %s1831_s18 = sld [smem:[#allocation19_spill]]  ;;  %vm625_vm1 = vcmask 1043456  }
  0x51   : > { %s323_s5 = scalar_select %p322_p11, %s1440_s28, 1  ;;  %1255 = vset.pattern.permute.xlu1 %v1461_v1  ;;  %537 = vmatprep.subr.mxu1 %v339_v2  ;;  %v336_v6 = vld [vmem:[%s1638_s24 + $0x20] sm:$0xff]  ;;  %v335_v8 = vld [vmem:[%s1638_s24 + $0x18] sm:$0xff]  ;;  %v341_v9 = vld [vmem:[%s1796_s2 + $0x8] sm:$0xff]  ;;  %vm621_vm2 = vcmask 64512  }
  0x52   : > { %s325_s10 = scalar_select %p324_p0, %s1436_s27, 1  ;;  %v340_v7 = vld [vmem:[%s1796_s2] sm:$0xff]  ;;  %538 = vmatpush1.msra.mxu1 %v338_v3  ;;  %v334_v10 = vld [vmem:[%s1638_s24 + $0x10] sm:$0xff]  ;;  %v333_v11 = vld [vmem:[%s1638_s24 + $0x8] sm:$0xff] }
  0x53   : > { %s1096_s12 = sshll.u32 %s323_s5, 1  ;;  %539 = vmatprep.subr.mxu1 %v337_v4  ;;  %1129 = vmatprep.mubr.msk.f32.mxu0 %vm368_vm0, %v340_v7  ;;  %v342_v12 = vld [vmem:[%s1796_s2 + $0x10] sm:$0xff]  ;;  %v332_v13 = vld [vmem:[%s1638_s24] sm:$0xff]  ;;  %v343_v17 = vld [vmem:[%s1796_s2 + $0x18] sm:$0xff]  ;;  %s1832_s19 = sld [smem:[#allocation12_spill]] }
  0x54   : > { %s327_s13 = sadd.s32 %s1096_s12, %s325_s10  ;;  %540 = vmatpush1.msra.mxu1 %v336_v6  ;;  %v344_v14 = vld [vmem:[%s1797_s3] sm:$0xff]  ;;  %v346_v16 = vld [vmem:[%s1797_s3 + $0x10] sm:$0xff]  ;;  %v345_v18 = vld [vmem:[%s1797_s3 + $0x8] sm:$0xff]  ;;  %s1116_s10 = sshll.u32 %s1436_s27, 3 }
  0x55   : > { %s1097_s15 = sshll.u32 %s327_s13, 3  ;;  %541 = vmatprep.subr.mxu1 %v335_v8  ;;  %v473_v15 = vld [vmem:[#allocation5] sm:$0xff]  ;;  %350 = vperm.xlu0 %1254, %v344_v14   ;;  %v474_v19 = vld [vmem:[#allocation5 + $0x8] sm:$0xff]  ;;  %v347_v20 = vld [vmem:[%s1797_s3 + $0x18] sm:$0xff]  ;;  %s1117_s12 = sshll.u32 %s1440_s28, 4 }
  0x56   : > { %s329_s11 = scalar_lea.vmem %s1794_s0, %s1097_s15  ;;  %542 = vmatpush1.msra.mxu1 %v334_v10  ;;  %360 = vperm.xlu1 %1255, %v346_v16   ;;  %v477_v21 = vld [vmem:[%s1831_s18] sm:$0xff]  ;;  %v475_v22 = vld [vmem:[#allocation5 + $0x10] sm:$0xff]  ;;  %v478_v23 = vld [vmem:[%s1831_s18 + $0x8] sm:$0xff]  ;;  %s968_s24 = sadd.s32 %s1117_s12, %s1116_s10 }
  0x57   : > { %v331_v5 = vld [vmem:[%s329_s11] sm:$0xff]  ;;  %543 = vmatprep.subr.mxu1 %v333_v11  ;;  %v479_v24 = vld [vmem:[%s1831_s18 + $0x10] sm:$0xff]  ;;  %v476_v25 = vld [vmem:[#allocation5 + $0x18] sm:$0xff]  ;;  %s1118_s13 = sshll.u32 %s968_s24, 7  ;;  %s1833_s8 = sld [smem:[#allocation14_spill]] }
  0x58   : > { %1127 = vmatprep.subr.msk.mxu0 %vm368_vm0, %v331_v5  ;;  %544 = vmatpush1.msra.mxu1 %v332_v13  ;;  %v480_v26 = vld [vmem:[%s1831_s18 + $0x18] sm:$0xff]  ;;  %s1834_s6 = sld [smem:[#allocation20_spill]]  ;;  %s1462_s21 = smov [#allocation7]  }
  0x59   : > { %1128 = vmatpush3.xpose.msk.msra.mxu0 %vm368_vm0, %v331_v5  ;;  %1103 = vmatmul.mubr.msk.f32.vlgmr.msra.gmra.mxu1 %vm368_vm0, %v473_v15  ;;  %s319_s20 = sand.u32 1, %s1832_s19   ;;  %s1332_s22 = sshll.u32 %s1462_s21, 4  ;;  %s1333_s22 = int_to_ptr.vmem [resolvable:$false] %s1332_s22 }
  0x5a   : > { %583 = vmatprep.mubr.f32.mxu1 %v1460_v0  ;;  %355 = vperm.xlu0 %1254, %v345_v18   ;;  %s1095_s5 = sshll.u32 %s319_s20, 6  ;;  %s956_s27 = scalar_lea.sflag [#allocation4], %s319_s20 }
  0x5b   : > { %365 = vperm.xlu1 %1255, %v347_v20   ;;  %s321_s15 = scalar_lea.vmem [#allocation7], %s1095_s5  ;;  %s1334_s17 = scalar_lea.vmem %s1333_s22, 2048 }
  0x5c   : > { %1130 = vmatmul.mubr.msk.f32.vlgmr.msra.gmra.mxu0 %vm368_vm0, %v341_v9  ;;  %s972_s16 = sshll.u32 %s321_s15, 4  ;;  %s1735_s16 = int_to_ptr.vmem [resolvable:$true] %s972_s16 }
  0x5d   : > { %1132 = vmatprep.mubr.msk.f32.mxu0 %vm368_vm0, %v342_v12  ;;  %1104 = vmatmul.mubr.msk.f32.gmra.mxu1 %vm368_vm0, %v474_v19  ;;  %s1328_s28 = scalar_lea.vmem %s1735_s16, 1024  ;;  %p1835_p3 = scmp.ne.s32.totalorder %s1833_s8, 0 }
  0x5e   : > { %589 = vmatprep.mubr.f32.mxu1 %v1460_v0  ;;  %483 = vperm.xlu0 %1254, %v477_v21   ;;  %s1733_s4 = scalar_lea.hbm %s1834_s6, %s1118_s13  ;;  %p1329_p1 = scmp.ne.s32.totalorder %s1735_s16, %s1328_s28 }
  0x5f   : > { %488 = vperm.xlu1 %1255, %v478_v23   ;;  %p1335_p6 = scmp.lt.s32.totalorder %s1735_s16, %s1333_s22  ;;  %p1336_p8 = scmp.lt.s32.totalorder %s1334_s17, %s1328_s28 }
  0x60   : > { %1133 = vmatmul.mubr.msk.f32.gmra.mxu0 %vm368_vm0, %v343_v17  ;;  %p1330_p13 = pnand %p1329_p1, %p1835_p3 }
  0x61   : > { %664 = vmatprep.mubr.bf16.mxu0 %v1461_v1  ;;  %1105 = vmatmul.mubr.msk.f32.gmra.mxu1 %vm368_vm0, %v475_v22  ;;  %p1337_p7 = por %p1336_p8, %p1335_p6 }
  0x62   : > { %595 = vmatprep.mubr.f32.mxu1 %v1460_v0  ;;  %493 = vperm.xlu0 %1254, %v479_v24   ;;  %p1331_p5 = pneg %p1330_p13 }
  0x63   : > { %498 = vperm.xlu1 %1255, %v480_v26  }
  0x64   : > { %p1338_p9 = pnand %p1337_p7, %p1331_p5 }
  0x65   : > { %1106 = vmatmul.mubr.msk.f32.gmra.mxu1 %vm368_vm0, %v476_v25 }
  0x66   : > { %806 = vmatprep.mubr.bf16.mxu1 %v1461_v1 }
  0xd0   : > { %v351_v27 = vpop.permute.xlu0 %350 }
  0xd1   : > { %v361_v28 = vpop.permute.xlu1 %360 }
  0xd5   : > { %v356_v29 = vpop.permute.xlu0 %355 }
  0xd6   : > { %v366_v32 = vpop.permute.xlu1 %365 }
  0xd9   : > { %v484_v34 = vpop.permute.xlu0 %483 }
  0xda   : > { %v489_v50 = vpop.permute.xlu1 %488 }
  0xdd   : > { %v494_v58 = vpop.permute.xlu0 %493 }
  0xde   : > { %v499_v8 = vpop.permute.xlu1 %498 }
 0x119   : > { %v579_v37 = vpop.f32.mrf.mxu1 }
 0x11a   : > { %v580_v38 = vadd.f32 %v579_v37, %v484_v34 }
 0x11b   : > { %v581_v42 = vpop.f32.mrf.mxu1 }
 0x11c   : > { %v1131_v30 = vpop.f32.mrf.mxu0  ;;  %v603_v44 = vpack.c.bf16 %v580_v38, %v580_v38  ;;  %v582_v45 = vadd.f32 %v581_v42, %v484_v34 }
 0x11d   : > { %v456_v31 = vadd.f32 %v1131_v30, %v356_v29  ;;  %v585_v49 = vpop.f32.mrf.mxu1 }
 0x11e   : > { %v450_v33 = vpop.f32.mrf.mxu0  ;;  %v604_v51 = vpack.c.bf16 %v582_v45, %v582_v45  ;;  %v586_v52 = vadd.f32 %v585_v49, %v489_v50  ;;  %v627_v56 = vsel %vm625_vm1, %v603_v44, 0 }
 0x11f   : > { %v470_v35 = vmul.f32 0.35355338, %v456_v31  ;;  %v451_v36 = vadd.f32 %v450_v33, %v351_v27  ;;  %v587_v55 = vpop.f32.mrf.mxu1 }
 0x120   : > { %v1134_v39 = vpop.f32.mrf.mxu0  ;;  %v588_v57 = vadd.f32 %v587_v55, %v489_v50  ;;  %1107 = vmatprep.subr.msk.bf16.mxu0 %vm625_vm1, %v604_v51  ;;  %v676_v9 = vpack.c.bf16 %v586_v52, %v586_v52 }
 0x121   : > { %v675_v40 = vpack.c.bf16 %v470_v35, %v470_v35  ;;  %v469_v41 = vmul.f32 0.35355338, %v451_v36  ;;  %v466_v43 = vadd.f32 %v1134_v39, %v366_v32  ;;  %v591_v60 = vpop.f32.mrf.mxu1  ;;  %647 = vmatpush1.bf16.msra.mxu0 %v627_v56 }
 0x122   : > { %v460_v46 = vpop.f32.mrf.mxu0  ;;  %v677_v61 = vpack.c.bf16 %v588_v57, %v588_v57  ;;  %v592_v62 = vadd.f32 %v591_v60, %v494_v58  ;;  %v698_v14 = vsel %vm625_vm1, %v676_v9, 0 }
 0x123   : > { %v602_v47 = vpack.c.bf16 %v469_v41, %v469_v41  ;;  %v461_v48 = vadd.f32 %v460_v46, %v361_v28  ;;  %678 = vxpose.xlu1.c.b16.start.end [1/1] (short) (narrow) %v675_v40, 16  ;;  %v472_v53 = vmul.f32 0.35355338, %v466_v43  ;;  %v593_v0 = vpop.f32.mrf.mxu1 }
 0x124   : > { %v747_v2 = vpack.c.bf16 %v592_v62, %v592_v62  ;;  %v594_v3 = vadd.f32 %v593_v0, %v494_v58  ;;  %1109 = vmatprep.subr.msk.bf16.mxu0 %vm625_vm1, %v677_v61 }
 0x125   : > { %v471_v54 = vmul.f32 0.35355338, %v461_v48  ;;  %605 = vxpose.xlu0.c.b16.start.end [1/1] (short) (narrow) %v602_v47, 16  ;;  %v817_v63 = vpack.c.bf16 %v472_v53, %v472_v53  ;;  %v597_v6 = vpop.f32.mrf.mxu1 }
 0x126   : > { %v748_v4 = vpack.c.bf16 %v594_v3, %v594_v3  ;;  %v769_v5 = vsel %vm625_vm1, %v747_v2, 0  ;;  %v598_v12 = vadd.f32 %v597_v6, %v499_v8 }
 0x127   : > { %v746_v59 = vpack.c.bf16 %v471_v54, %v471_v54  ;;  %v599_v7 = vpop.f32.mrf.mxu1 }
 0x128   : > { %1111 = vmatprep.subr.msk.bf16.mxu1 %vm625_vm1, %v748_v4  ;;  %v600_v10 = vadd.f32 %v599_v7, %v499_v8  ;;  %v818_v16 = vpack.c.bf16 %v598_v12, %v598_v12 }
 0x129   : > { %749 = vxpose.xlu0.c.b16.start.end [1/1] (short) (narrow) %v746_v59, 16  ;;  %789 = vmatpush1.bf16.msra.mxu1 %v769_v5 }
 0x12a   : > { %v819_v13 = vpack.c.bf16 %v600_v10, %v600_v10  ;;  %v840_v18 = vsel %vm625_vm1, %v818_v16, 0 }
 0x12d   : > { %820 = vxpose.xlu0.c.b16.start.end [1/1] (short) (narrow) %v817_v63, 16 }
 0x185   : > { %v686_v17 = vpop.trf.xlu1 }
 0x187   : > { %v613_v11 = vpop.trf.xlu0 }
 0x188   : > { %1108 = vmatmul.mubr.msk.bf16.vlgmr.msra.gmra.mxu0 %vm621_vm2, %v613_v11 }
 0x189   : > { %718 = vmatpush1.bf16.msra.mxu0 %v698_v14  ;;  %735 = vmatprep.mubr.bf16.mxu0 %v1461_v1 }
 0x18a   : > { %1113 = vmatprep.subr.msk.bf16.mxu0 %vm625_vm1, %v819_v13 }
 0x18b   : > { %v757_v15 = vpop.trf.xlu0 }
 0x18c   : > { %1112 = vmatmul.mubr.msk.bf16.vlgmr.msra.gmra.mxu1 %vm621_vm2, %v757_v15 }
 0x18f   : > { %v828_v19 = vpop.trf.xlu0 }
 0x190   : > { %1110 = vmatmul.mubr.msk.bf16.vlgmr.msra.gmra.mxu0 %vm621_vm2, %v686_v17 }
 0x191   : > { %860 = vmatpush1.bf16.msra.mxu0 %v840_v18  ;;  %877 = vmatprep.mubr.bf16.mxu0 %v1461_v1 }
 0x198   : > { %1114 = vmatmul.mubr.msk.bf16.vlgmr.msra.gmra.mxu0 %vm621_vm2, %v828_v19 }
 0x248   : > { %v666_v20 = vpop.f32.mrf.mxu0 }
 0x24a   : > { %v668_v21 = vpop.f32.mrf.mxu0 }
 0x24c   : > { %v670_v22 = vpop.f32.mrf.mxu0  ;;  %v808_v23 = vpop.f32.mrf.mxu1 }
 0x24d   : > { %v896_v35 = vmax.f32 %v666_v20, %v808_v23 }
 0x24e   : > { %v671_v24 = vpop.f32.mrf.mxu0  ;;  %v810_v25 = vpop.f32.mrf.mxu1 }
 0x24f   : > { %v897_v33 = vmax.f32 %v668_v21, %v810_v25 }
 0x250   : > { %v737_v26 = vpop.f32.mrf.mxu0  ;;  %v812_v27 = vpop.f32.mrf.mxu1 }
 0x251   : > { %v900_v38 = vmax.f32 %v896_v35, %v897_v33 }
 0x252   : > { %v739_v28 = vpop.f32.mrf.mxu0  ;;  %v813_v29 = vpop.f32.mrf.mxu1 }
 0x254   : > { %v741_v30 = vpop.f32.mrf.mxu0 }
 0x256   : > { %v742_v31 = vpop.f32.mrf.mxu0 }
 0x258   : > { %v879_v32 = vpop.f32.mrf.mxu0 }
 0x259   : > { %v898_v1 = vmax.f32 %v737_v26, %v879_v32 }
 0x25a   : > { %v881_v34 = vpop.f32.mrf.mxu0 }
 0x25b   : > { %v899_v36 = vmax.f32 %v739_v28, %v881_v34 }
 0x25c   : > { %v883_v37 = vpop.f32.mrf.mxu0 }
 0x25d   : > { %v901_v39 = vmax.f32 %v898_v1, %v899_v36 }
 0x25e   : > { %v884_v40 = vpop.f32.mrf.mxu0 }
 0x25f   : > { %v902_v41 = vmax.f32 %v900_v38, %v901_v39 }
 0x261   : > { %903 = vmax.xlane.f32.xlu1 %v902_v41 }
 0x2ea   : > { %v904_v42 = vpop.xlane.xlu1 %903 }
 0x2eb   : > { %v905_v43 = vsub.f32 %v666_v20, %v904_v42  ;;  %v906_v44 = vsub.f32 %v668_v21, %v904_v42  ;;  %v907_v45 = vsub.f32 %v737_v26, %v904_v42  ;;  %v908_v46 = vsub.f32 %v739_v28, %v904_v42 }
 0x2ec   : > { %v909_v49 = vsub.f32 %v808_v23, %v904_v42  ;;  %v910_v51 = vsub.f32 %v810_v25, %v904_v42  ;;  %v911_v53 = vsub.f32 %v879_v32, %v904_v42  ;;  %v912_v55 = vsub.f32 %v881_v34, %v904_v42 }
 0x2ed   : > { %v913_v47 = vmul.f32 1.442695, %v905_v43  ;;  %v915_v48 = vmul.f32 1.442695, %v906_v44  ;;  %v917_v50 = vmul.f32 1.442695, %v907_v45 }
 0x2ee   : > { %v919_v52 = vmul.f32 1.442695, %v908_v46  ;;  %v921_v54 = vmul.f32 1.442695, %v909_v49  ;;  %v923_v56 = vmul.f32 1.442695, %v910_v51 }
 0x2ef   : > { %1256 = vpow2.f32 %v913_v47  ;;  %v925_v57 = vmul.f32 1.442695, %v911_v53  ;;  %v927_v58 = vmul.f32 1.442695, %v912_v55 }
 0x2f0   : > { %1258 = vpow2.f32 %v915_v48 }
 0x2f1   : > { %1260 = vpow2.f32 %v917_v50 }
 0x2f2   : > { %1262 = vpow2.f32 %v919_v52 }
 0x2f3   : > { %1264 = vpow2.f32 %v921_v54 }
 0x2f4   : > { %1266 = vpow2.f32 %v923_v56 }
 0x2f5   : > { %1268 = vpow2.f32 %v925_v57 }
 0x2f6   : > { %1270 = vpow2.f32 %v927_v58 }
 0x2fc   : > { %v1257_v59 = vpop.eup %1256 }
 0x2fd   : > { %v1259_v60 = vpop.eup %1258 }
 0x2fe   : > { %v929_v61 = vadd.f32 %v1259_v60, %v1257_v59  ;;  %v1261_v62 = vpop.eup %1260 }
 0x2ff   : > { %v1263_v0 = vpop.eup %1262 }
 0x300   : > { %v930_v63 = vadd.f32 %v1261_v62, %v929_v61  ;;  %v1265_v3 = vpop.eup %1264 }
 0x301   : > { %v1267_v5 = vpop.eup %1266 }
 0x302   : > { %v931_v2 = vadd.f32 %v1263_v0, %v930_v63  ;;  %v1269_v7 = vpop.eup %1268 }
 0x303   : > { %v1271_v9 = vpop.eup %1270 }
 0x304   : > { %v932_v4 = vadd.f32 %v1265_v3, %v931_v2 }
 0x306   : > { %v933_v6 = vadd.f32 %v1267_v5, %v932_v4 }
 0x308   : > { %v934_v8 = vadd.f32 %v1269_v7, %v933_v6 }
 0x30a   : > { %v935_v10 = vadd.f32 %v1271_v9, %v934_v8 }
 0x30c   : > { %936 = vadd.xlane.f32.xlu0 %v935_v10 }
 0x395   : > { %v937_v11 = vpop.xlane.xlu0 %936 }
 0x396   : > { %1272 = vrcp.f32 %v937_v11 }
 0x3a3   : > { %v1273_v12 = vpop.eup %1272 }
 0x3a4   : > { %v939_v13 = vmul.f32 %v1273_v12, %v1257_v59  ;;  %v940_v14 = vmul.f32 %v1273_v12, %v1259_v60  ;;  %v941_v15 = vmul.f32 %v1273_v12, %v1261_v62  ;;  %v942_v16 = vmul.f32 %v1273_v12, %v1263_v0 }
 0x3a5   : > { %v943_v17 = vmul.f32 %v1273_v12, %v1265_v3  ;;  %v944_v18 = vmul.f32 %v1273_v12, %v1267_v5  ;;  %v945_v19 = vmul.f32 %v1273_v12, %v1269_v7  ;;  %v946_v20 = vmul.f32 %v1273_v12, %v1271_v9 }
 0x3a6   : > { %947 = vst [vmem:[%s321_s15] sm:$0xff] %v939_v13  ;;  %948 = vst [vmem:[%s321_s15 + $0x8] sm:$0xff] %v940_v14 }
 0x3a7   : > { %949 = vst [vmem:[%s321_s15 + $0x10] sm:$0xff] %v941_v15  ;;  %950 = vst [vmem:[%s321_s15 + $0x18] sm:$0xff] %v942_v16 }
 0x3a8   : > { %951 = vst [vmem:[%s321_s15 + $0x20] sm:$0xff] %v943_v17  ;;  %952 = vst [vmem:[%s321_s15 + $0x28] sm:$0xff] %v944_v18 }
 0x3a9   : > { %953 = vst [vmem:[%s321_s15 + $0x30] sm:$0xff] %v945_v19  ;;  %954 = vst [vmem:[%s321_s15 + $0x38] sm:$0xff] %v946_v20 }
 0x3aa   : > { %1341 = shalt.err (!%p1338_p9)
}
 0x3ab   : > { %s1342_s19 = scalar_lea.hbm %s1733_s4, 1024  ;;  %s1346_s10 = scalar_lea.hbm %s1834_s6, 4096 }
 0x3ac   : > { %p1343_p10 = scmp.ne.s32.totalorder %s1733_s4, %s1342_s19  ;;  %p1347_p4 = scmp.lt.s32.totalorder %s1733_s4, %s1834_s6 }
 0x3ad   : > { %p1348_p11 = scmp.lt.s32.totalorder %s1346_s10, %s1342_s19 }
 0x3ae   : > { %p1344_p12 = pnand %p1343_p10, %p1835_p3 }
 0x3af   : > { %p1349_p0 = por %p1348_p11, %p1347_p4 }
 0x3b0   : > { %p1345_p2 = pneg %p1344_p12 }
 0x3b2   : > { %p1350_p1 = pnand %p1349_p0, %p1345_p2 }
 0x3b4   : > { %1353 = shalt.err (!%p1350_p1)
}
 0x3b5   : > { %1141 = dma.vmem_to_hbm [thread:$0]  (%p1835_p3), %s1735_s16, 1024, %s1733_s4, %s956_s27  }
 0x3b6 PF: > { %s1836_s13 = sld [smem:[#allocation11_spill]]  ;;  %p1158_p13 = scmp.ge.s32.totalorder %s1452_s7, 2 }
 0x3b7   : > { %s1837_s15 = sld [smem:[#allocation15_spill]] }
 0x3bc   : > { %s984_s11 = sand.u32 1, %s1836_s13  }
 0x3bd   : > { %p1838_p5 = scmp.ne.s32.totalorder %s1837_s15, 0  ;;  %s985_s9 = scalar_lea.sflag [#allocation4], %s984_s11 }
 0x3bf   : > { %p1152_p6 = pnand %p1158_p13, %p1838_p5 }
 0x3c1   : > { %p1153_p8 = pneg %p1152_p6 }
 0x3c3   : > { %1407 = dma.done.wait (%p1153_p8), %s985_s9, 1024  }
 0x3c4   : > { %1409 = vsyncadd (%p1153_p8), %s985_s9, 4294966272  ;;  %s23_s7 = sadd.s32 1, %s1452_s7   ;;  %s1839_s21 = sld [smem:[#allocation12_spill]] }
 0x3c5   : > { %p20_p7 = scmp.ge.s32.totalorder %s23_s7, 6   ;;  %s1840_s27 = sld [smem:[#allocation13_spill]] }
 0x3c6   : > { %s1841_s16 = sld [smem:[#allocation16_spill]]  ;;  %s1843_s22 = smov %s1420_s23 }
 0x3c7   : > { %s1842_s8 = sld [smem:[#allocation17_spill]]  ;;  %s1844_s23 = smov %s1618_s29 }
 0x3c8   : > { %s1845_s24 = smov %s1428_s25  ;;  %s1846_s25 = smov %s1432_s26 }
 0x3c9   : > { %s1847_s26 = smov %s1613_s14  ;;  %s1848_s28 = smov %s1448_s30 }
 0x3ca   :  { %22 = sbr.rel (!%p20_p7) target bundleno = 14 (0xe), region = 96 }
 0x3cc   : > { %s1849_s29 = smov %s1841_s16 }
 0x3cd   : > { %s1850_s30 = smov %s1842_s8 }
 0x3cf   :  { %990 = vsyncpa [#allocation3], 1 }
 0x3d0   :  { %992 = vsyncpa [#allocation3 + $0x1], 1 }
 0x3d1   :  { %993 = vsyncpa [#allocation6], 1 }
 0x3d2   :  { %994 = vsyncpa [#allocation4], 1 }
 0x3d3   :  { %996 = vsyncpa [#allocation4 + $0x1], 1 }

</bundles_post_ra>
